<compile_context>
chip_gen: v5e
topology: v5e:2x2
jax: 0.10.0
libtpu: 0.0.40
codegen_flags: <defaults>
</compile_context>

<pallas_src>
import math

import jax
import jax.numpy as jnp
from jax import lax
from jax.experimental import pallas as pl
from jax.experimental.pallas import tpu as pltpu


# ----------------------------------------------------------------------------
# host-side precompute helpers
# ----------------------------------------------------------------------------
def _erf(x):
    # Abramowitz & Stegun 7.1.26 (max abs err ~1.5e-7) -> erf-style nn.GELU with
    # only exp + elementwise ops inside the kernel.
    a1, a2, a3, a4, a5 = 0.254829592, -0.284496736, 1.421413741, -1.453152027, 1.061405429
    p = 0.3275911
    s = jnp.where(x >= 0.0, 1.0, -1.0)
    z = jnp.abs(x)
    t = 1.0 / (1.0 + p * z)
    poly = t * (a1 + t * (a2 + t * (a3 + t * (a4 + t * a5))))
    return s * (1.0 - poly * jnp.exp(-z * z))


def sinusoidal_pos_emb(L, D):
    pos = jnp.arange(L, dtype=jnp.float32)[:, None]
    div = jnp.exp(jnp.arange(0, D, 2, dtype=jnp.float32) * (-math.log(10000.0) / D))
    pe = jnp.zeros((L, D), jnp.float32)
    pe = pe.at[:, 0::2].set(jnp.sin(pos * div))
    pe = pe.at[:, 1::2].set(jnp.cos(pos * div))
    return pe


def make_dct_matrices(N):
    # torch_dct.dct / idct with norm=None, expressed as matmuls along the last dim.
    n = jnp.arange(N, dtype=jnp.float32)
    k = jnp.arange(N, dtype=jnp.float32)
    ang = math.pi * k[:, None] * (2.0 * n[None, :] + 1.0) / (2.0 * N)   # (k, n)
    w_dct = (2.0 * jnp.cos(ang)).T            # y = x @ w_dct   (DCT-II, scale 2)
    m = jnp.cos(ang) / N
    m = m.at[0, :].set(1.0 / (2.0 * N))
    w_idct = m                                # x = y @ w_idct  (exact inverse)
    return w_dct, w_idct


def make_avg_matrix(L, K):
    # Edge-replicated moving average (Autoformer series_decomp) as an (L, L) matrix:
    # trend = A_avg @ xn  (one MXU matmul instead of a K-tap shift/add loop).
    # TODO(synk): for large win_size this should become a banded / roll-and-add form.
    front = K - 1 - (K - 1) // 2
    idx = jnp.clip(jnp.arange(L)[:, None] + jnp.arange(K)[None, :] - front, 0, L - 1)
    return jax.nn.one_hot(idx, L, dtype=jnp.float32).sum(axis=1) / K


# ----------------------------------------------------------------------------
# Pallas kernels
# ----------------------------------------------------------------------------
def _front_kernel(x_ref, rw_ref, rb_ref, avg_ref, we2_ref, pos_ref, we1d_ref, posd_ref,
                  trend_ref, xemb_ref, xnewd_ref):
    # RevIN(norm) + series_decomp + DataEmbedding2(xn) + [DataEmbedding1 . DCT](seasonal)
    x = x_ref[0]                                            # (L, M)
    L, M = x.shape
    mean = jnp.mean(x, axis=0, keepdims=True)
    var = jnp.mean((x - mean) ** 2, axis=0, keepdims=True)
    xn = (x - mean) * lax.rsqrt(var + 1e-5)                 # RevIN 'norm'
    xn = xn * rw_ref[...] + rb_ref[...]

    trend = jnp.dot(avg_ref[...], xn.astype(jnp.bfloat16),
                    preferred_element_type=jnp.float32)     # (L, M)
    seasonal = xn - trend

    def embed(v, w3_ref, p):
        # circular Conv1d (kernel=3, pad=1, no bias) as ONE fused (L,3M)@(3M,D) matmul
        vm1 = jnp.roll(v, 1, axis=0)                        # v[(t-1) mod L]
        vp1 = jnp.roll(v, -1, axis=0)                       # v[(t+1) mod L]
        cat = jnp.concatenate([vm1, v, vp1], axis=-1).astype(jnp.bfloat16)
        return jnp.dot(cat, w3_ref[...], preferred_element_type=jnp.float32) + p

    trend_ref[0] = trend
    xemb_ref[0] = embed(xn, we2_ref, pos_ref[...])
    # emb1 weights / pos are pre-multiplied by the DCT matrix -> this IS dct(x_new)
    xnewd_ref[0] = embed(seasonal, we1d_ref, posd_ref[...])


def _mamba_kernel(perm_ref, x_ref, win_ref, convw_ref, convb_ref,
                  wdbc_ref, bdbc_ref, aT_ref, dvec_ref, wout_ref,
                  o_ref,
                  dt_s, u_s, b_s, c_s, h_s, y_s):
    # One fused Mamba block (mamba_ssm semantics): in-proj, causal depthwise conv,
    # [dt|B|C] projection (dt-proj folded), selective scan with VMEM-resident state,
    # D-skip, SiLU(z) gate and out-proj.
    L = x_ref.shape[1]
    d_conv, d_inner = convw_ref.shape
    d_state = aT_ref.shape[0]

    # optional time flip via a per-grid-step permutation matrix (identity / reversal)
    x = jnp.dot(perm_ref[0], x_ref[0], preferred_element_type=jnp.float32)   # (L, Dm)

    # in-projection (bias-free) -> [x | z]
    xz = jnp.dot(x.astype(jnp.bfloat16), win_ref[...],
                 preferred_element_type=jnp.float32)                          # (L, 2*di)
    xi = xz[:, :d_inner]
    z = xz[:, d_inner:]

    # causal depthwise conv1d (kernel d_conv, left zero-pad) + bias, then SiLU
    row = lax.broadcasted_iota(jnp.int32, (L, 1), 0)
    xc = jnp.zeros((L, d_inner), jnp.float32) + convb_ref[...]
    for k in range(d_conv):
        s = d_conv - 1 - k
        tap = convw_ref[k:k + 1, :]                          # (1, d_inner)
        if s == 0:
            shifted = xi
        else:
            shifted = jnp.where(row >= s, jnp.roll(xi, s, axis=0), 0.0)
        xc = xc + shifted * tap
    xa = xc * (1.0 / (1.0 + jnp.exp(-xc)))                   # SiLU

    # fused [dt | B | C] projection (dt projection folded into x projection at init)
    dbc = (jnp.dot(xa.astype(jnp.bfloat16), wdbc_ref[...],
                   preferred_element_type=jnp.float32) + bdbc_ref[...])
    dt_pre = dbc[:, :d_inner]
    dt = jnp.maximum(dt_pre, 0.0) + jnp.log(1.0 + jnp.exp(-jnp.abs(dt_pre)))  # softplus

    # stage per-step operands in VMEM scratch for row-sliced access in the scan
    dt_s[...] = dt
    u_s[...] = dt * xa
    b_s[...] = dbc[:, d_inner:d_inner + d_state]
    c_s[...] = dbc[:, d_inner + d_state:]
    h_s[...] = jnp.zeros_like(h_s)

    aT = aT_ref[...]                                         # (d_state, d_inner)

    def step(t, carry):
        dt_t = dt_s[pl.ds(t, 1), :]                          # (1, d_inner)
        u_t = u_s[pl.ds(t, 1), :]                            # (1, d_inner)
        b_t = b_s[pl.ds(t, 1), :]                            # (1, d_state)
        c_t = c_s[pl.ds(t, 1), :]                            # (1, d_state)
        dA_t = jnp.exp(dt_t * aT)                            # (d_state, d_inner), EUP exp
        # outer product b_t^T @ u_t as a K=1 dot_general (lane-dense result)
        dBx_t = lax.dot_general(b_t, u_t, (((0,), (0,)), ((), ())),
                                preferred_element_type=jnp.float32)
        h = h_s[...] * dA_t + dBx_t                          # (d_state, d_inner)
        h_s[...] = h
        y_s[pl.ds(t, 1), :] = jnp.dot(c_t, h, preferred_element_type=jnp.float32)
        return carry

    lax.fori_loop(0, L, step, 0, unroll=4)

    y = y_s[...] + xa * dvec_ref[...]                        # D skip
    y = y * (z * (1.0 / (1.0 + jnp.exp(-z))))                # SiLU(z) gate
    o_ref[0] = jnp.dot(y.astype(jnp.bfloat16), wout_ref[...],
                       preferred_element_type=jnp.float32)


def _fre_attn_kernel(x_ref, trend_ref, wqkv_ref, bqkv_ref, wt_ref, bt_ref, o_ref):
    # AttentionLayer(FullAttention), n_heads=1, fused QKV + folded tail
    # (W_tail = wo @ W_idct @ proj2_w), plus the trend residual add.
    # TODO(synk): for large win_size this should be KV-tiled with an online-softmax.
    x = x_ref[0]                                             # (L, D)
    D = x.shape[-1]
    qkv = (jnp.dot(x.astype(jnp.bfloat16), wqkv_ref[...],
                   preferred_element_type=jnp.float32) + bqkv_ref[...])
    q = qkv[:, :D]
    k = qkv[:, D:2 * D]
    v = qkv[:, 2 * D:]
    s = lax.dot_general(q.astype(jnp.bfloat16), k.astype(jnp.bfloat16),
                        (((1,), (1,)), ((), ())),
                        preferred_element_type=jnp.float32) * (1.0 / math.sqrt(D))
    s = s - jnp.max(s, axis=-1, keepdims=True)
    e = jnp.exp(s)
    a = e * pl.reciprocal(jnp.sum(e, axis=-1, keepdims=True), approx=True)
    out = jnp.dot(a.astype(jnp.bfloat16), v.astype(jnp.bfloat16),
                  preferred_element_type=jnp.float32)
    o_ref[0] = (jnp.dot(out.astype(jnp.bfloat16), wt_ref[...],
                        preferred_element_type=jnp.float32)
                + bt_ref[...] + trend_ref[0])


def _time_head_kernel(a_ref, b_ref, lnw_ref, lnb_ref, w_ref, bias_ref, o_ref):
    # (TE(x) + TE(flip(x))) -> GELU (erf) -> LayerNorm -> Linear
    x = a_ref[...] + b_ref[...]
    g = 0.5 * x * (1.0 + _erf(x * (1.0 / math.sqrt(2.0))))
    mu = jnp.mean(g, axis=-1, keepdims=True)
    var = jnp.mean((g - mu) ** 2, axis=-1, keepdims=True)
    h = (g - mu) * lax.rsqrt(var + 1e-5)
    h = h * lnw_ref[...] + lnb_ref[...]
    o_ref[...] = (jnp.dot(h.astype(jnp.bfloat16), w_ref[...],
                          preferred_element_type=jnp.float32) + bias_ref[...])


# ----------------------------------------------------------------------------
# pallas_call wrappers
# ----------------------------------------------------------------------------
_PARALLEL_1D = pltpu.CompilerParams(dimension_semantics=("parallel",))


def front_fused(x, p):
    B, L, M = x.shape
    D = p['d_model']
    spec_x = pl.BlockSpec((1, L, M), lambda b: (b, 0, 0))
    spec_oD = pl.BlockSpec((1, L, D), lambda b: (b, 0, 0))
    return pl.pallas_call(
        _front_kernel,
        grid=(B,),
        in_specs=[spec_x,
                  pl.BlockSpec((1, M), lambda b: (0, 0)),
                  pl.BlockSpec((1, M), lambda b: (0, 0)),
                  pl.BlockSpec((L, L), lambda b: (0, 0)),
                  pl.BlockSpec((3 * M, D), lambda b: (0, 0)),
                  pl.BlockSpec((L, D), lambda b: (0, 0)),
                  pl.BlockSpec((3 * M, D), lambda b: (0, 0)),
                  pl.BlockSpec((L, D), lambda b: (0, 0))],
        out_specs=(spec_x, spec_oD, spec_oD),
        out_shape=(jax.ShapeDtypeStruct((B, L, M), jnp.float32),
                   jax.ShapeDtypeStruct((B, L, D), jnp.float32),
                   jax.ShapeDtypeStruct((B, L, D), jnp.float32)),
        compiler_params=_PARALLEL_1D,
    )(x, p['revin_w'], p['revin_b'], p['avg_mat'], p['emb2_w3'], p['pos_emb'],
      p['emb1_w3_dct'], p['pos_dct'])


def mamba_forward(p, x, perm):
    # perm: (n_rep, L, L) stack of permutation matrices; grid step g runs the block on
    # perm[g // B] @ x[g % B]  (n_rep=2 => [identity; time-reversal] for TE(x)/TE(flip(x))).
    Bb, L, Dm = x.shape
    n_rep = perm.shape[0]
    G = n_rep * Bb
    d_inner, d_state, d_conv = p['d_inner'], p['d_state'], p['d_conv']
    dbc_w = d_inner + 2 * d_state
    return pl.pallas_call(
        _mamba_kernel,
        grid=(G,),
        in_specs=[
            pl.BlockSpec((1, L, L), lambda g: (g // Bb, 0, 0)),
            pl.BlockSpec((1, L, Dm), lambda g: (g % Bb, 0, 0)),
            pl.BlockSpec((Dm, 2 * d_inner), lambda g: (0, 0)),
            pl.BlockSpec((d_conv, d_inner), lambda g: (0, 0)),
            pl.BlockSpec((1, d_inner), lambda g: (0, 0)),
            pl.BlockSpec((d_inner, dbc_w), lambda g: (0, 0)),
            pl.BlockSpec((1, dbc_w), lambda g: (0, 0)),
            pl.BlockSpec((d_state, d_inner), lambda g: (0, 0)),
            pl.BlockSpec((1, d_inner), lambda g: (0, 0)),
            pl.BlockSpec((d_inner, Dm), lambda g: (0, 0)),
        ],
        out_specs=pl.BlockSpec((1, L, Dm), lambda g: (g, 0, 0)),
        out_shape=jax.ShapeDtypeStruct((G, L, Dm), jnp.float32),
        scratch_shapes=[pltpu.VMEM((L, d_inner), jnp.float32),       # dt
                        pltpu.VMEM((L, d_inner), jnp.float32),       # u = dt * xa
                        pltpu.VMEM((L, d_state), jnp.float32),       # B
                        pltpu.VMEM((L, d_state), jnp.float32),       # C
                        pltpu.VMEM((d_state, d_inner), jnp.float32),  # h (lane-dense)
                        pltpu.VMEM((L, d_inner), jnp.float32)],      # y
        compiler_params=_PARALLEL_1D,
    )(perm, x, p['w_in'], p['conv_w'], p['conv_b'], p['w_dbc'], p['b_dbc'],
      p['a_T'], p['d_vec'], p['w_out'])


def fre_attention(x, trend_out, wqkv, bqkv, w_tail, b_tail):
    B, L, D = x.shape
    C = w_tail.shape[1]
    return pl.pallas_call(
        _fre_attn_kernel,
        grid=(B,),
        in_specs=[pl.BlockSpec((1, L, D), lambda b: (b, 0, 0)),
                  pl.BlockSpec((1, L, C), lambda b: (b, 0, 0)),
                  pl.BlockSpec((D, 3 * D), lambda b: (0, 0)),
                  pl.BlockSpec((1, 3 * D), lambda b: (0, 0)),
                  pl.BlockSpec((D, C), lambda b: (0, 0)),
                  pl.BlockSpec((1, C), lambda b: (0, 0))],
        out_specs=pl.BlockSpec((1, L, C), lambda b: (b, 0, 0)),
        out_shape=jax.ShapeDtypeStruct((B, L, C), jnp.float32),
        compiler_params=_PARALLEL_1D,
    )(x, trend_out, wqkv, bqkv, w_tail, b_tail)


def time_head(a2d, b2d, ln_w, ln_b, w, b):
    # >=2 row blocks so both v7x TensorCores are used (neutral on v5e/v6e).
    N, D = a2d.shape
    Dout = w.shape[1]
    nb = 2 if (N % 16 == 0) else 1
    rb = N // nb
    return pl.pallas_call(
        _time_head_kernel,
        grid=(nb,),
        in_specs=[pl.BlockSpec((rb, D), lambda i: (i, 0)),
                  pl.BlockSpec((rb, D), lambda i: (i, 0)),
                  pl.BlockSpec((1, D), lambda i: (0, 0)),
                  pl.BlockSpec((1, D), lambda i: (0, 0)),
                  pl.BlockSpec((D, Dout), lambda i: (0, 0)),
                  pl.BlockSpec((1, Dout), lambda i: (0, 0))],
        out_specs=pl.BlockSpec((rb, Dout), lambda i: (i, 0)),
        out_shape=jax.ShapeDtypeStruct((N, Dout), jnp.float32),
        compiler_params=_PARALLEL_1D,
    )(a2d, b2d, ln_w, ln_b, w, b)


# ----------------------------------------------------------------------------
# parameter init (mamba_ssm / reference semantics, random weights)
# ----------------------------------------------------------------------------
def init_mamba_params(key, d_model, d_state, d_conv=4, expand=2):
    d_inner = expand * d_model
    dt_rank = math.ceil(d_model / 16)
    ks = jax.random.split(key, 5)
    w_xproj = jax.random.normal(ks[2], (d_inner, dt_rank + 2 * d_state), jnp.float32) * 0.02
    w_dt = jax.random.normal(ks[3], (dt_rank, d_inner), jnp.float32) * 0.1
    b_dt = jnp.full((d_inner,), -4.0, jnp.float32)
    # Fold the dt projection into the x projection: one matmul yields [dt_pre | B | C].
    w_dbc = jnp.concatenate([w_xproj[:, :dt_rank] @ w_dt, w_xproj[:, dt_rank:]], axis=1)
    b_dbc = jnp.concatenate([b_dt, jnp.zeros((2 * d_state,), jnp.float32)]).reshape(1, -1)
    A_log = jnp.log(jnp.broadcast_to(
        jnp.arange(1, d_state + 1, dtype=jnp.float32), (d_inner, d_state)))
    return {
        'd_inner': d_inner, 'd_state': d_state, 'd_conv': d_conv,
        'w_in': (jax.random.normal(ks[0], (d_model, 2 * d_inner), jnp.float32)
                 * 0.02).astype(jnp.bfloat16),
        'conv_w': jax.random.normal(ks[1], (d_conv, d_inner), jnp.float32) * 0.1,
        'conv_b': jnp.zeros((1, d_inner), jnp.float32),
        'w_dbc': w_dbc.astype(jnp.bfloat16), 'b_dbc': b_dbc,
        'a_T': (-jnp.exp(A_log)).T,                          # (d_state, d_inner)
        'd_vec': jnp.ones((1, d_inner), jnp.float32),
        'w_out': (jax.random.normal(ks[4], (d_inner, d_model), jnp.float32)
                  * 0.02).astype(jnp.bfloat16),
    }


def init_attention_params(key, d_model):
    ks = jax.random.split(key, 4)

    def w(k):
        return jax.random.normal(k, (d_model, d_model), jnp.float32) * 0.02

    z = jnp.zeros((1, d_model), jnp.float32)
    return {'wq': w(ks[0]), 'bq': z, 'wk': w(ks[1]), 'bk': z,
            'wv': w(ks[2]), 'bv': z, 'wo': w(ks[3]), 'bo': z}


def init_params(key, win_size, enc_in, c_out, n_heads=1, d_model=64,
                e_layers=3, kernel_size=25):
    assert n_heads == 1, "this Pallas port implements the default n_heads=1"
    assert c_out == enc_in, "reference adds (B,L,enc_in) trend onto (B,L,c_out) fre"
    ks = jax.random.split(key, 10)
    L = win_size
    w_dct, w_idct = make_dct_matrices(d_model)

    # circular-conv token embedding weights, tap-major layout (3M, D)
    emb1_w = jax.random.normal(ks[0], (3 * enc_in, d_model), jnp.float32) * 0.05
    emb2_w = jax.random.normal(ks[1], (3 * enc_in, d_model), jnp.float32) * 0.05
    pos = sinusoidal_pos_emb(L, d_model)

    proj2_w = jax.random.normal(ks[3], (d_model, c_out), jnp.float32) * 0.02
    proj2_b = jnp.zeros((1, c_out), jnp.float32)

    # Only the last attention layer's output is kept by the reference Encoder, so only
    # that layer is materialized (earlier layers are dead compute in the reference).
    attn = init_attention_params(ks[8], d_model)
    w_io = w_idct @ proj2_w                                  # (d_model, c_out)

    eye = jnp.eye(L, dtype=jnp.float32)
    rev = eye[::-1]
    return {
        'd_model': d_model, 'c_out': c_out,
        'revin_w': jnp.ones((1, enc_in), jnp.float32),
        'revin_b': jnp.zeros((1, enc_in), jnp.float32),
        'avg_mat': make_avg_matrix(L, kernel_size).astype(jnp.bfloat16),
        'emb2_w3': emb2_w.astype(jnp.bfloat16),
        'emb1_w3_dct': (emb1_w @ w_dct).astype(jnp.bfloat16),    # DCT folded into conv
        'pos_emb': pos,
        'pos_dct': pos @ w_dct,                                  # DCT folded into pos
        'ln_w': jnp.ones((1, d_model), jnp.float32),
        'ln_b': jnp.zeros((1, d_model), jnp.float32),
        'proj1_w': (jax.random.normal(ks[2], (d_model, c_out), jnp.float32)
                    * 0.02).astype(jnp.bfloat16),
        'proj1_b': jnp.zeros((1, c_out), jnp.float32),
        'wqkv': jnp.concatenate([attn['wq'], attn['wk'], attn['wv']],
                                axis=1).astype(jnp.bfloat16),
        'bqkv': jnp.concatenate([attn['bq'], attn['bk'], attn['bv']], axis=1),
        'w_tail': (attn['wo'] @ w_io).astype(jnp.bfloat16),      # wo . idct . proj2
        'b_tail': attn['bo'] @ w_io + proj2_b,
        'perm_id': eye[None],                                    # (1, L, L)
        'perm_fwd_rev': jnp.stack([eye, rev], axis=0),           # (2, L, L)
        'mamba_trend': init_mamba_params(ks[4], enc_in, win_size),
        'mamba_te': init_mamba_params(ks[5], d_model, win_size),
    }


# ----------------------------------------------------------------------------
# full forward
# ----------------------------------------------------------------------------
def d3contrast_forward(params, x):
    B, L, M = x.shape
    d_model, c_out = params['d_model'], params['c_out']

    # fused: RevIN + series_decomp + both embeddings (emb1 already DCT'd)
    trend, x_emb, x_new_dct = front_fused(x, params)

    # trend branch: one fused Mamba call (grid = B)
    trend_out = mamba_forward(params['mamba_trend'], trend, params['perm_id'])

    # time branch: TE(x) and TE(flip(x)) in ONE fused Mamba call (grid = 2B; the flip
    # is applied in-kernel by the per-grid-step permutation matrix).
    te_out = mamba_forward(params['mamba_te'], x_emb, params['perm_fwd_rev'])
    time = time_head(te_out[:B].reshape(-1, d_model), te_out[B:].reshape(-1, d_model),
                     params['ln_w'], params['ln_b'],
                     params['proj1_w'], params['proj1_b']).reshape(B, L, c_out)

    # frequency branch: attention on dct'd embedding, folded idct/proj2 tail + trend
    # TODO(synk): final (B, L, c_out) stores are lane-narrow (c_out < 128); a lane-dense
    # slab layout would need an in-kernel (L,c_out)->(1,L*c_out) relayout, skipped here.
    fre = fre_attention(x_new_dct, trend_out, params['wqkv'], params['bqkv'],
                        params['w_tail'], params['b_tail'])
    return time, fre


# ----------------------------------------------------------------------------
if __name__ == "__main__":
    B, L, M = 2, 16, 8          # batch, win_size, enc_in (c_out == enc_in)
    d_model = 64
    key = jax.random.PRNGKey(0)
    pkey, xkey = jax.random.split(key)
    params = init_params(pkey, win_size=L, enc_in=M, c_out=M, n_heads=1,
                         d_model=d_model, e_layers=3, kernel_size=25)
    x = jax.random.normal(xkey, (B, L, M), jnp.float32)

    time, fre = d3contrast_forward(params, x)
    (time, fre) = jax.block_until_ready((time, fre))

    assert time.shape == (B, L, M) and fre.shape == (B, L, M)
    assert bool(jnp.all(jnp.isfinite(time))) and bool(jnp.all(jnp.isfinite(fre)))
    print("KERNEL_OK")
</pallas_src>

<mosaic_0001>
module attributes {stable_mosaic.version = 11 : i64} {
  func.func @_front_kernel(%arg0: i32, %arg1: memref<1x16x8xf32, #tpu.memory_space<vmem>>, %arg2: memref<1x8xf32, #tpu.memory_space<vmem>>, %arg3: memref<1x8xf32, #tpu.memory_space<vmem>>, %arg4: memref<16x16xbf16, #tpu.memory_space<vmem>>, %arg5: memref<24x64xbf16, #tpu.memory_space<vmem>>, %arg6: memref<16x64xf32, #tpu.memory_space<vmem>>, %arg7: memref<24x64xbf16, #tpu.memory_space<vmem>>, %arg8: memref<16x64xf32, #tpu.memory_space<vmem>>, %arg9: memref<1x16x8xf32, #tpu.memory_space<vmem>>, %arg10: memref<1x16x64xf32, #tpu.memory_space<vmem>>, %arg11: memref<1x16x64xf32, #tpu.memory_space<vmem>>) attributes {dimension_semantics = [#tpu.dimension_semantics<parallel>], iteration_bounds = array<i64: 2>, scalar_prefetch = 0 : i64, scratch_operands = 0 : i64, tpu.core_type = #tpu.core_type<tc>, window_params = [{transform_indices = @transform_0, window_bounds = array<i64: 1, 16, 8>}, {pipeline_mode = #tpu.pipeline_mode<synchronous>, transform_indices = @transform_1, window_bounds = array<i64: 1, 8>}, {pipeline_mode = #tpu.pipeline_mode<synchronous>, transform_indices = @transform_2, window_bounds = array<i64: 1, 8>}, {pipeline_mode = #tpu.pipeline_mode<synchronous>, transform_indices = @transform_3, window_bounds = array<i64: 16, 16>}, {pipeline_mode = #tpu.pipeline_mode<synchronous>, transform_indices = @transform_4, window_bounds = array<i64: 24, 64>}, {pipeline_mode = #tpu.pipeline_mode<synchronous>, transform_indices = @transform_5, window_bounds = array<i64: 16, 64>}, {pipeline_mode = #tpu.pipeline_mode<synchronous>, transform_indices = @transform_6, window_bounds = array<i64: 24, 64>}, {pipeline_mode = #tpu.pipeline_mode<synchronous>, transform_indices = @transform_7, window_bounds = array<i64: 16, 64>}, {transform_indices = @transform_8, window_bounds = array<i64: 1, 16, 8>}, {transform_indices = @transform_9, window_bounds = array<i64: 1, 16, 64>}, {transform_indices = @transform_10, window_bounds = array<i64: 1, 16, 64>}]} {
    %c0 = arith.constant 0 : index
    %c0_0 = arith.constant 0 : index
    %c0_1 = arith.constant 0 : index
    %0 = vector.load %arg1[%c0, %c0_0, %c0_1] : memref<1x16x8xf32, #tpu.memory_space<vmem>>, vector<1x16x8xf32>
    %1 = vector.shape_cast %0 : vector<1x16x8xf32> to vector<16x8xf32>
    %cst = arith.constant dense<0.000000e+00> : vector<8xf32>
    %2 = vector.multi_reduction <add>, %1, %cst [0] : vector<16x8xf32> to vector<8xf32>
    %3 = vector.shape_cast %2 : vector<8xf32> to vector<1x8xf32>
    %cst_2 = arith.constant 1.600000e+01 : f32
    %4 = vector.broadcast %cst_2 : f32 to vector<1x8xf32>
    %5 = arith.divf %3, %4 : vector<1x8xf32>
    %6 = vector.broadcast %5 : vector<1x8xf32> to vector<16x8xf32>
    %7 = arith.subf %1, %6 : vector<16x8xf32>
    %8 = arith.mulf %7, %7 : vector<16x8xf32>
    %cst_3 = arith.constant dense<0.000000e+00> : vector<8xf32>
    %9 = vector.multi_reduction <add>, %8, %cst_3 [0] : vector<16x8xf32> to vector<8xf32>
    %10 = vector.shape_cast %9 : vector<8xf32> to vector<1x8xf32>
    %cst_4 = arith.constant 1.600000e+01 : f32
    %11 = vector.broadcast %cst_4 : f32 to vector<1x8xf32>
    %12 = arith.divf %10, %11 : vector<1x8xf32>
    %13 = vector.broadcast %5 : vector<1x8xf32> to vector<16x8xf32>
    %14 = arith.subf %1, %13 : vector<16x8xf32>
    %cst_5 = arith.constant 9.99999974E-6 : f32
    %15 = vector.broadcast %cst_5 : f32 to vector<1x8xf32>
    %16 = arith.addf %12, %15 : vector<1x8xf32>
    %17 = math.rsqrt %16 : vector<1x8xf32>
    %18 = vector.broadcast %17 : vector<1x8xf32> to vector<16x8xf32>
    %19 = arith.mulf %14, %18 : vector<16x8xf32>
    %c0_6 = arith.constant 0 : index
    %c0_7 = arith.constant 0 : index
    %20 = vector.load %arg2[%c0_6, %c0_7] : memref<1x8xf32, #tpu.memory_space<vmem>>, vector<1x8xf32>
    %21 = vector.broadcast %20 : vector<1x8xf32> to vector<16x8xf32>
    %22 = arith.mulf %19, %21 : vector<16x8xf32>
    %c0_8 = arith.constant 0 : index
    %c0_9 = arith.constant 0 : index
    %23 = vector.load %arg3[%c0_8, %c0_9] : memref<1x8xf32, #tpu.memory_space<vmem>>, vector<1x8xf32>
    %24 = vector.broadcast %23 : vector<1x8xf32> to vector<16x8xf32>
    %25 = arith.addf %22, %24 : vector<16x8xf32>
    %c0_10 = arith.constant 0 : index
    %c0_11 = arith.constant 0 : index
    %26 = vector.load %arg4[%c0_10, %c0_11] : memref<16x16xbf16, #tpu.memory_space<vmem>>, vector<16x16xbf16>
    %27 = arith.truncf %25 : vector<16x8xf32> to vector<16x8xbf16>
    %cst_12 = arith.constant dense<0.000000e+00> : vector<16x8xf32>
    %28 = tpu.matmul %26, %27, %cst_12 {dimension_numbers = #tpu.dot_dimension_numbers<[1], [0], [0], [1], [0, 0, 1, 1], [], []>} : vector<16x16xbf16>, vector<16x8xbf16>, vector<16x8xf32> -> vector<16x8xf32>
    %29 = arith.subf %25, %28 : vector<16x8xf32>
    %c0_13 = arith.constant 0 : index
    %c0_14 = arith.constant 0 : index
    %c0_15 = arith.constant 0 : index
    %30 = vector.load %arg9[%c0_13, %c0_14, %c0_15] : memref<1x16x8xf32, #tpu.memory_space<vmem>>, vector<1x16x8xf32>
    %31 = vector.shape_cast %30 : vector<1x16x8xf32> to vector<16x8xf32>
    %32 = vector.shape_cast %28 : vector<16x8xf32> to vector<1x16x8xf32>
    tpu.vector_store %arg9[%c0_13, %c0_14, %c0_15], %32 {strides = array<i32>} : memref<1x16x8xf32, #tpu.memory_space<vmem>>, vector<1x16x8xf32>,
    %c0_16 = arith.constant 0 : index
    %c0_17 = arith.constant 0 : index
    %33 = vector.load %arg6[%c0_16, %c0_17] : memref<16x64xf32, #tpu.memory_space<vmem>>, vector<16x64xf32>
    %34 = vector.extract_strided_slice %25 {offsets = [15, 0], sizes = [1, 8], strides = [1, 1]} : vector<16x8xf32> to vector<1x8xf32>
    %35 = vector.extract_strided_slice %25 {offsets = [0, 0], sizes = [15, 8], strides = [1, 1]} : vector<16x8xf32> to vector<15x8xf32>
    %36 = tpu.concatenate %34, %35 in 0 : vector<1x8xf32>, vector<15x8xf32> -> vector<16x8xf32>
    %37 = vector.extract_strided_slice %25 {offsets = [1, 0], sizes = [15, 8], strides = [1, 1]} : vector<16x8xf32> to vector<15x8xf32>
    %38 = vector.extract_strided_slice %25 {offsets = [0, 0], sizes = [1, 8], strides = [1, 1]} : vector<16x8xf32> to vector<1x8xf32>
    %39 = tpu.concatenate %37, %38 in 0 : vector<15x8xf32>, vector<1x8xf32> -> vector<16x8xf32>
    %40 = tpu.concatenate %36, %25, %39 in 1 : vector<16x8xf32>, vector<16x8xf32>, vector<16x8xf32> -> vector<16x24xf32>
    %41 = arith.truncf %40 : vector<16x24xf32> to vector<16x24xbf16>
    %c0_18 = arith.constant 0 : index
    %c0_19 = arith.constant 0 : index
    %42 = vector.load %arg5[%c0_18, %c0_19] : memref<24x64xbf16, #tpu.memory_space<vmem>>, vector<24x64xbf16>
    %cst_20 = arith.constant dense<0.000000e+00> : vector<16x64xf32>
    %43 = tpu.matmul %41, %42, %cst_20 {dimension_numbers = #tpu.dot_dimension_numbers<[1], [0], [0], [1], [0, 0, 1, 1], [], []>} : vector<16x24xbf16>, vector<24x64xbf16>, vector<16x64xf32> -> vector<16x64xf32>
    %44 = arith.addf %43, %33 : vector<16x64xf32>
    %c0_21 = arith.constant 0 : index
    %c0_22 = arith.constant 0 : index
    %c0_23 = arith.constant 0 : index
    %45 = vector.load %arg10[%c0_21, %c0_22, %c0_23] : memref<1x16x64xf32, #tpu.memory_space<vmem>>, vector<1x16x64xf32>
    %46 = vector.shape_cast %45 : vector<1x16x64xf32> to vector<16x64xf32>
    %47 = vector.shape_cast %44 : vector<16x64xf32> to vector<1x16x64xf32>
    tpu.vector_store %arg10[%c0_21, %c0_22, %c0_23], %47 {strides = array<i32>} : memref<1x16x64xf32, #tpu.memory_space<vmem>>, vector<1x16x64xf32>,
    %c0_24 = arith.constant 0 : index
    %c0_25 = arith.constant 0 : index
    %48 = vector.load %arg8[%c0_24, %c0_25] : memref<16x64xf32, #tpu.memory_space<vmem>>, vector<16x64xf32>
    %49 = vector.extract_strided_slice %29 {offsets = [15, 0], sizes = [1, 8], strides = [1, 1]} : vector<16x8xf32> to vector<1x8xf32>
    %50 = vector.extract_strided_slice %29 {offsets = [0, 0], sizes = [15, 8], strides = [1, 1]} : vector<16x8xf32> to vector<15x8xf32>
    %51 = tpu.concatenate %49, %50 in 0 : vector<1x8xf32>, vector<15x8xf32> -> vector<16x8xf32>
    %52 = vector.extract_strided_slice %29 {offsets = [1, 0], sizes = [15, 8], strides = [1, 1]} : vector<16x8xf32> to vector<15x8xf32>
    %53 = vector.extract_strided_slice %29 {offsets = [0, 0], sizes = [1, 8], strides = [1, 1]} : vector<16x8xf32> to vector<1x8xf32>
    %54 = tpu.concatenate %52, %53 in 0 : vector<15x8xf32>, vector<1x8xf32> -> vector<16x8xf32>
    %55 = tpu.concatenate %51, %29, %54 in 1 : vector<16x8xf32>, vector<16x8xf32>, vector<16x8xf32> -> vector<16x24xf32>
    %56 = arith.truncf %55 : vector<16x24xf32> to vector<16x24xbf16>
    %c0_26 = arith.constant 0 : index
    %c0_27 = arith.constant 0 : index
    %57 = vector.load %arg7[%c0_26, %c0_27] : memref<24x64xbf16, #tpu.memory_space<vmem>>, vector<24x64xbf16>
    %cst_28 = arith.constant dense<0.000000e+00> : vector<16x64xf32>
    %58 = tpu.matmul %56, %57, %cst_28 {dimension_numbers = #tpu.dot_dimension_numbers<[1], [0], [0], [1], [0, 0, 1, 1], [], []>} : vector<16x24xbf16>, vector<24x64xbf16>, vector<16x64xf32> -> vector<16x64xf32>
    %59 = arith.addf %58, %48 : vector<16x64xf32>
    %c0_29 = arith.constant 0 : index
    %c0_30 = arith.constant 0 : index
    %c0_31 = arith.constant 0 : index
    %60 = vector.load %arg11[%c0_29, %c0_30, %c0_31] : memref<1x16x64xf32, #tpu.memory_space<vmem>>, vector<1x16x64xf32>
    %61 = vector.shape_cast %60 : vector<1x16x64xf32> to vector<16x64xf32>
    %62 = vector.shape_cast %59 : vector<16x64xf32> to vector<1x16x64xf32>
    tpu.vector_store %arg11[%c0_29, %c0_30, %c0_31], %62 {strides = array<i32>} : memref<1x16x64xf32, #tpu.memory_space<vmem>>, vector<1x16x64xf32>,
    return
  }
  func.func @transform_0(%arg0: i32) -> (i32, i32, i32) {
    %c0_i32 = arith.constant 0 : i32
    %c0_i32_0 = arith.constant 0 : i32
    %c0_i32_1 = arith.constant 0 : i32
    return %arg0, %c0_i32, %c0_i32_0 : i32, i32, i32
  }
  func.func @transform_1(%arg0: i32) -> (i32, i32) {
    %c0_i32 = arith.constant 0 : i32
    %c0_i32_0 = arith.constant 0 : i32
    %c0_i32_1 = arith.constant 0 : i32
    return %c0_i32, %c0_i32_0 : i32, i32
  }
  func.func @transform_2(%arg0: i32) -> (i32, i32) {
    %c0_i32 = arith.constant 0 : i32
    %c0_i32_0 = arith.constant 0 : i32
    %c0_i32_1 = arith.constant 0 : i32
    return %c0_i32, %c0_i32_0 : i32, i32
  }
  func.func @transform_3(%arg0: i32) -> (i32, i32) {
    %c0_i32 = arith.constant 0 : i32
    %c0_i32_0 = arith.constant 0 : i32
    %c0_i32_1 = arith.constant 0 : i32
    return %c0_i32, %c0_i32_0 : i32, i32
  }
  func.func @transform_4(%arg0: i32) -> (i32, i32) {
    %c0_i32 = arith.constant 0 : i32
    %c0_i32_0 = arith.constant 0 : i32
    %c0_i32_1 = arith.constant 0 : i32
    return %c0_i32, %c0_i32_0 : i32, i32
  }
  func.func @transform_5(%arg0: i32) -> (i32, i32) {
    %c0_i32 = arith.constant 0 : i32
    %c0_i32_0 = arith.constant 0 : i32
    %c0_i32_1 = arith.constant 0 : i32
    return %c0_i32, %c0_i32_0 : i32, i32
  }
  func.func @transform_6(%arg0: i32) -> (i32, i32) {
    %c0_i32 = arith.constant 0 : i32
    %c0_i32_0 = arith.constant 0 : i32
    %c0_i32_1 = arith.constant 0 : i32
    return %c0_i32, %c0_i32_0 : i32, i32
  }
  func.func @transform_7(%arg0: i32) -> (i32, i32) {
    %c0_i32 = arith.constant 0 : i32
    %c0_i32_0 = arith.constant 0 : i32
    %c0_i32_1 = arith.constant 0 : i32
    return %c0_i32, %c0_i32_0 : i32, i32
  }
  func.func @transform_8(%arg0: i32) -> (i32, i32, i32) {
    %c0_i32 = arith.constant 0 : i32
    %c0_i32_0 = arith.constant 0 : i32
    %c0_i32_1 = arith.constant 0 : i32
    return %arg0, %c0_i32, %c0_i32_0 : i32, i32, i32
  }
  func.func @transform_9(%arg0: i32) -> (i32, i32, i32) {
    %c0_i32 = arith.constant 0 : i32
    %c0_i32_0 = arith.constant 0 : i32
    %c0_i32_1 = arith.constant 0 : i32
    return %arg0, %c0_i32, %c0_i32_0 : i32, i32, i32
  }
  func.func @transform_10(%arg0: i32) -> (i32, i32, i32) {
    %c0_i32 = arith.constant 0 : i32
    %c0_i32_0 = arith.constant 0 : i32
    %c0_i32_1 = arith.constant 0 : i32
    return %arg0, %c0_i32, %c0_i32_0 : i32, i32, i32
  }
}

</mosaic_0001>

<bundles_post_ra>
// kernel: tpu_custom_call.1
= control target key start
LH: loop header
LB: loop body
LE: loop exit
PB: predicated region body
PF: predicated region fallthrough
CT: control target
= control target key end

     0   :  { %s1413_s0 = inlined_call_operand.vmem [shape: f32[2,16,8], index: 0, kind: input, shape index: {}]   ;;  %s1414_s1 = inlined_call_operand.vmem [shape: f32[1,8], index: 1, kind: input, shape index: {}]   ;;  %s1415_s2 = inlined_call_operand.vmem [shape: f32[1,8], index: 2, kind: input, shape index: {}]   ;;  %s1416_s3 = inlined_call_operand.hbm [shape: bf16[16,16], index: 3, kind: input, shape index: {}]   ;;  %s1417_s4 = inlined_call_operand.vmem [shape: bf16[24,64], index: 4, kind: input, shape index: {}]   ;;  %s1418_s5 = inlined_call_operand.vmem [shape: f32[16,64], index: 5, kind: input, shape index: {}]   ;;  %s1419_s6 = inlined_call_operand.hbm [shape: bf16[24,64], index: 6, kind: input, shape index: {}]   ;;  %s1420_s7 = inlined_call_operand.vmem [shape: f32[16,64], index: 7, kind: input, shape index: {}]   ;;  %s1421_s8 = inlined_call_operand.vmem [shape: f32[2,16,8], index: 8, kind: output, shape index: {0}]   ;;  %s1422_s9 = inlined_call_operand.hbm [shape: f32[2,16,64], index: 9, kind: output, shape index: {1}]   ;;  %s1423_s10 = inlined_call_operand.hbm [shape: f32[2,16,64], index: 10, kind: output, shape index: {2}]  }
   0x1   :  { %1428 = sst [smem:[#allocation15_spill]] %s1413_s0 }
   0x2   :  { %1429 = sst [smem:[#allocation16_spill]] %s1414_s1 }
   0x3   :  { %1430 = sst [smem:[#allocation17_spill]] %s1415_s2 }
   0x4   :  { %1431 = sst [smem:[#allocation18_spill]] %s1416_s3 }
   0x5   :  { %1432 = sst [smem:[#allocation19_spill]] %s1417_s4 }
   0x6   :  { %16 = vsyncpa [#allocation3], 0 }
   0x7   :  { %17 = vsyncpa [#allocation6], 0 }
   0x8   :  { %18 = vsyncpa [#allocation4], 0 }
   0x9   :  { %20 = vsyncpa [#allocation4 + $0x1], 0 }
   0xa   :  { %21 = vsyncpa [#allocation9], 0 }
   0xb   :  { %23 = vsyncpa [#allocation9 + $0x1], 0  ;;  %s1204_s13 = smov 0   ;;  %s1206_s14 = smov 0  }
   0xc   :  { %s1208_s15 = smov 0   ;;  %s1210_s16 = smov 0  }
   0xd LB: > { %s1225_s17 = sadd.s32 4294967295, %s1139_s16   ;;  %s836_s18 = sadd.s32 4294967294, %s1139_s16   ;;  %s1139_s16 = sphi %s1210_s16, %s1449_s16   ;;  %s1135_s15 = sphi %s1208_s15, %s1448_s15   ;;  %s1131_s14 = sphi %s1206_s14, %s1447_s14   ;;  %s1127_s13 = sphi %s1204_s13, %s1446_s13  }
   0xe   : > { %s1229_s19 = sadd.s32 1, %s1139_s16   ;;  %s235_s20 = sadd.s32 1, %s1135_s15 }
   0xf   : > { %s232_s21 = ssub.s32 %s1139_s16, %s1229_s19  ;;  %p245_p0 = scmp.ne.s32.totalorder %s1135_s15, %s1131_s14 }
  0x10   : > { %p233_p1 = scmp.eq.s32.totalorder %s232_s21, 0  ;;  %p246_p2 = scmp.eq.s32.totalorder %s1225_s17, 1 }
  0x11   : > { %p251_p3 = scmp.ne.s32.totalorder %s1131_s14, %s1127_s13  ;;  %p252_p4 = scmp.eq.s32.totalorder %s836_s18, 1 }
  0x12   : > { %s1240_s22 = scalar_select %p233_p1, %s1135_s15, %s235_s20  }
  0x13   : > { %p1242_p5 = por %p246_p2, %p245_p0  ;;  %p1246_p6 = por %p252_p4, %p251_p3 }
  0x14   : > { %1433 = sst [smem:[#allocation14_spill]] %s1240_s22  ;;  %p837_p7 = scmp.ge.s32.totalorder %s1139_s16, 1 }
  0x15   : > { %p285_p8 = scmp.lt.s32.totalorder %s1139_s16, 3  ;;  %p906_p9 = scmp.eq.s32.totalorder %s1225_s17, 0 }
  0x16   : > { %s1437_s3 = sld [smem:[#allocation18_spill]]  ;;  %s1141_s29 = smov [#allocation2]  }
  0x17   : > { %p1253_p10 = pnand %p837_p7, %p285_p8  ;;  %s304_s30 = sshll.u32 %s1141_s29, 4  ;;  %s305_s30 = int_to_ptr.vmem [resolvable:$true] %s304_s30 }
  0x18   : > { %s322_s18 = sshll.u32 %s1419_s6, 4  ;;  %s1142_s20 = smov 64   ;;  %s323_s18 = int_to_ptr.hbm [resolvable:$true] %s322_s18 }
  0x19   : > { %p892_p11 = pneg %p1253_p10  ;;  %s1143_s21 = smov 4  }
  0x1a   : > { %s1144_s22 = smov [#allocation5]   ;;  %351 = sbr.rel (%p1253_p10) target bundleno = 522 (0x20a), region = 52 }
  0x1b   : > { %p893_p12 = pnand %p906_p9, %p892_p11  ;;  %s324_s26 = sshll.u32 %s1144_s22, 4  ;;  %s325_s26 = int_to_ptr.vmem [resolvable:$true] %s324_s26 }
  0x1c   : > { %s302_s28 = sshll.u32 %s1437_s3, 4  ;;  %s303_s28 = int_to_ptr.hbm [resolvable:$true] %s302_s28 }
  0x1d   : > { %895 = dma.hbm_to_vmem [thread:$0]  (!%p893_p12), %s303_s28, 128, %s305_s30, [#allocation3], %s1142_s20, %s1142_s20, %s1143_s21  }
  0x1e   : > { %898 = dma.hbm_to_vmem [thread:$0]  (!%p893_p12), %s323_s18, 192, %s325_s26, [#allocation6], %s1142_s20, %s1142_s20, %s1143_s21  }
  0x1f   : > { %1110 = dma.done.wait (%p906_p9), [#allocation3], 128  }
  0x20   : > { %1112 = vsyncadd (%p906_p9), [#allocation3], 4294967168 }
  0x21   : > { %1114 = dma.done.wait (%p906_p9), [#allocation6], 192  }
  0x22   : > { %1116 = vsyncadd (%p906_p9), [#allocation6], 4294967104  ;;  %p405_p13 = scmp.lt.s32.totalorder %s1225_s17, 1  ;;  %v1145_v0 = vmov 16.0   ;;  %s1438_s0 = sld [smem:[#allocation15_spill]]  ;;  %vm418_vm0 = vcmask 64512  }
  0x23   : > { %973 = vrcp.f32 %v1145_v0  ;;  %s1439_s1 = sld [smem:[#allocation16_spill]]  ;;  %v875_v50 = vld [vmem:[#allocation2] sm:$0xff]  ;;  %vm483_vm5 = vcmask 130048   ;;  %s1424_s20 = smov 8   ;;  %vm517_vm6 = vcmask 1046528   ;;  %vm511_vm7 = vcmask 1040384  }
  0x24   : > { %s1279_s22 = scalar_select %p405_p13, %s1225_s17, 1  ;;  %vm558_vm8 = vcmask 1043456   ;;  %vm554_vm9 = vcmask 195584   ;;  %vm576_vm10 = vcmask 523264  }
  0x25   : > { %s1440_s2 = sld [smem:[#allocation17_spill]]  ;;  %s1147_s21 = smov 16  }
  0x26   : > { %s873_s25 = sshll.u32 %s1279_s22, 4  ;;  %s1441_s4 = sld [smem:[#allocation19_spill]] }
  0x27   : > { %s414_s28 = scalar_lea.vmem %s1421_s8, %s873_s25  ;;  %s1334_s11 = sand.u32 1, %s1131_s14  }
  0x28   : > { %s409_s29 = scalar_lea.vmem %s1438_s0, %s873_s25  ;;  %s1426_s12 = sshll.u32 %s1334_s11, 4 }
  0x29   : > { %v974_v1 = vpop.eup %973  ;;  %v416_v2 = vld [vmem:[%s409_s29] sm:$0xff]  ;;  %v417_v3 = vld [vmem:[%s409_s29 + $0x8] sm:$0xff]  ;;  %s1427_s26 = sshll.u32 %s1225_s17, 4  ;;  %s397_s27 = scalar_lea.vmem [#allocation7], %s1426_s12 }
  0x2a   : > { %v419_v4 = vsel %vm418_vm0, %v416_v2, 0.0  ;;  %v420_v5 = vsel %vm418_vm0, %v417_v3, 0.0  ;;  %v429_v6 = vmul.f32 16.0, %v974_v1  ;;  %vm433_vm1 = vweird.f32 %v974_v1  ;;  %v971_v40 = vld [vmem:[%s1439_s1] ss:$0 sm:$0xff]  ;;  %s673_s25 = scalar_lea.hbm %s1422_s9, %s1427_s26  ;;  %s674_s29 = sshll.u32 %s397_s27, 4  ;;  %s675_s29 = int_to_ptr.vmem [resolvable:$true] %s674_s29 }
  0x2b   : > { %v421_v7 = vadd.f32 %v420_v5, %v419_v4  ;;  %v972_v44 = vld [vmem:[%s1440_s2] ss:$0 sm:$0xff]  ;;  %s676_s18 = sshll.u32 %s673_s25, 4  ;;  %s677_s18 = int_to_ptr.hbm [resolvable:$true] %s676_s18 }
  0x2c   : > { %v430_v8 = vsub.f32 1.0, %v429_v6  ;;  %s1051_s12 = sshra.s32 %s677_s18, 4  ;;  %s1052_s12 = int_to_ptr.hbm [resolvable:$true] %s1051_s12 }
  0x2d   : > { %v422_v9 = vrot.slane %v421_v7, 4  ;;  %s1053_s0 = scalar_lea.hbm %s1052_s12, 16  ;;  %p1058_p3 = scmp.lt.s32.totalorder %s1052_s12, %s1422_s9 }
  0x2e   : > { %v431_v10 = vmul.f32 %v974_v1, %v430_v8  ;;  %p1054_p0 = scmp.ne.s32.totalorder %s1052_s12, %s1053_s0 }
  0x2f   : > { %v423_v11 = vadd.f32 %v422_v9, %v421_v7  ;;  %v544_v7 = vld [vmem:[%s1441_s4 + $0x8] sm:$0xf] }
  0x30   : > { %v432_v13 = vadd.f32 %v974_v1, %v431_v10  ;;  %v550_v8 = vunpack.c.l.b16 %v544_v7  ;;  %p1055_p1 = pnand %p1054_p0, %p1242_p5 }
  0x31   : > { %v424_v12 = vrot.slane %v423_v11, 2 }
  0x32   : > { %v434_v16 = vsel %vm433_vm1, %v974_v1, %v432_v13  ;;  %v552_v9 = vpack.c.b16 %v550_v8, %v550_v8  ;;  %p1056_p2 = pneg %p1055_p1 }
  0x33   : > { %v425_v14 = vadd.f32 %v424_v12, %v423_v11 }
  0x34   : > { %v560_v10 = vsel %vm558_vm8, %v552_v9, 0 }
  0x35   : > { %v426_v15 = vrot.slane %v425_v14, 1  ;;  %568 = vmatpush.bf16.msra.mxu1 %v560_v10 }
  0x37   : > { %v427_v17 = vadd.f32 %v426_v15, %v425_v14 }
  0x39   : > { %v435_v18 = vmul.f32 %v434_v16, %v427_v17 }
  0x3b   : > { %v436_v19 = vsub.f32 %v416_v2, %v435_v18  ;;  %v437_v20 = vsub.f32 %v417_v3, %v435_v18 }
  0x3d   : > { %v438_v21 = vmul.f32 %v436_v19, %v436_v19  ;;  %v439_v22 = vmul.f32 %v437_v20, %v437_v20 }
  0x3f   : > { %v440_v23 = vsel %vm418_vm0, %v438_v21, 0.0  ;;  %v441_v24 = vsel %vm418_vm0, %v439_v22, 0.0 }
  0x40   : > { %v442_v25 = vadd.f32 %v441_v24, %v440_v23  ;;  %v876_v23 = vld [vmem:[%s1441_s4] sm:$0xff]  ;;  %v616_v24 = vld [vmem:[#allocation5 + $0x8] sm:$0xf] }
  0x41   : > { %569 = vmatpush.bf16.msra.mxu1 %v876_v23 }
  0x42   : > { %v443_v26 = vrot.slane %v442_v25, 4 }
  0x44   : > { %v444_v27 = vadd.f32 %v443_v26, %v442_v25 }
  0x46   : > { %v445_v28 = vrot.slane %v444_v27, 2 }
  0x48   : > { %v446_v29 = vadd.f32 %v445_v28, %v444_v27  ;;  %v622_v27 = vunpack.c.l.b16 %v616_v24 }
  0x4a   : > { %v447_v30 = vrot.slane %v446_v29, 1 }
  0x4c   : > { %v448_v31 = vadd.f32 %v447_v30, %v446_v29  ;;  %v624_v29 = vpack.c.b16 %v622_v27, %v622_v27 }
  0x4e   : > { %v449_v32 = vmul.f32 %v448_v31, %v434_v16  ;;  %v630_v30 = vsel %vm558_vm8, %v624_v29, 0  ;;  %v877_v31 = vld [vmem:[#allocation5] sm:$0xff] }
  0x4f   : > { %638 = vmatpush.bf16.msra.mxu2 %v630_v30 }
  0x50   : > { %v450_v33 = vadd.f32 1e-05, %v449_v32 }
  0x52   : > { %975 = vrsqrt.f32 %v450_v33  ;;  %vm457_vm2 = vweird.f32 %v450_v33 }
  0x53   : > { %639 = vmatpush.bf16.msra.mxu2 %v877_v31 }
  0x58   : > { %v976_v34 = vpop.eup %975 }
  0x59   : > { %v452_v35 = vmul.f32 %v976_v34, %v450_v33  ;;  %vm458_vm3 = vweird.f32 %v976_v34 }
  0x5a   : > { %vm459_vm4 = vmor %vm457_vm2, %vm458_vm3 }
  0x5b   : > { %v453_v36 = vmul.f32 %v976_v34, %v452_v35 }
  0x5d   : > { %v454_v37 = vmul.f32 0.5, %v453_v36 }
  0x5f   : > { %v455_v38 = vsub.f32 1.5, %v454_v37 }
  0x61   : > { %v456_v39 = vmul.f32 %v976_v34, %v455_v38 }
  0x63   : > { %v460_v41 = vsel %vm459_vm4, %v976_v34, %v456_v39 }
  0x64   : > { %v461_v42 = vmul.f32 %v460_v41, %v436_v19  ;;  %v462_v43 = vmul.f32 %v460_v41, %v437_v20 }
  0x66   : > { %v467_v45 = vmul.f32 %v971_v40, %v461_v42  ;;  %v468_v46 = vmul.f32 %v971_v40, %v462_v43  ;;  %v505_v43 = vld [vmem:[%s1418_s5] sm:$0xff] }
  0x68   : > { %v473_v47 = vadd.f32 %v972_v44, %v467_v45  ;;  %v474_v48 = vadd.f32 %v972_v44, %v468_v46  ;;  %v506_v46 = vld [vmem:[%s1418_s5 + $0x8] sm:$0xff] }
  0x6a   : > { %v477_v49 = vpack.c.bf16 %v474_v48, %v473_v47  ;;  %v961_v51 = vpack.i.bf16 %v474_v48, %v473_v47  ;;  %v518_v52 = vrot.slane %v473_v47, 1  ;;  %v519_v53 = vrot.slane %v474_v48, 1 }
  0x6b   : > { %v508_v12 = vrot.slane %v474_v48, 7  ;;  %v512_v13 = vrot.slane %v473_v47, 7 }
  0x6c   : > { %494 = vmatpush.bf16.msra.mxu0 %v477_v49  ;;  %962 = vrot.lane.b32.xlu1 %v961_v51, %s1424_s20  ;;  %v520_v54 = vsel %vm517_vm6, %v518_v52, %v519_v53  ;;  %v523_v55 = vsel %vm517_vm6, %v519_v53, %v518_v52 }
  0x6d   : > { %v966_v56 = vpack.i.bf16 %v523_v55, %v520_v54  ;;  %v513_v16 = vsel %vm511_vm7, %v512_v13, %v508_v12  ;;  %v516_v17 = vsel %vm511_vm7, %v508_v12, %v512_v13 }
  0x6f   : > { %854 = vmatmul.msk.bf16.vlgmr.msra.gmra.mxu0 %vm483_vm5, %v875_v50 }
  0x74   : > { %967 = vrot.lane.b32.xlu1 %v966_v56, %s1147_s21 }
  0xde   : > { %v963_v11 = vpop.permute.xlu1 %962 }
  0xdf   : > { %v965_v14 = vunpack.i.h.bf16 %v963_v11  ;;  %v964_v15 = vunpack.i.l.bf16 %v963_v11 }
  0xe1   : > { %v537_v18 = vsel %vm418_vm0, %v516_v17, %v964_v15  ;;  %v538_v19 = vsel %vm418_vm0, %v513_v16, %v965_v14 }
  0xe6   : > { %v968_v20 = vpop.permute.xlu1 %967 }
  0xe7   : > { %v970_v21 = vunpack.i.h.bf16 %v968_v20  ;;  %v969_v22 = vunpack.i.l.bf16 %v968_v20 }
  0xe9   : > { %v539_v25 = vsel %vm483_vm5, %v537_v18, %v969_v22  ;;  %v540_v26 = vsel %vm483_vm5, %v538_v19, %v970_v21 }
  0xea   : > { %v541_v28 = vpack.c.bf16 %v540_v26, %v539_v25 }
  0xec   : > { %v496_v57 = vpop.f32.mrf.mxu0  ;;  %859 = vmatmul.msk.bf16.vlgmr.msra.gmra.mxu1 %vm554_vm9, %v541_v28 }
  0xed   : > { %503 = vst.msk [vmem:[%s414_s28] sm:$0xff] %vm418_vm0, %v496_v57  ;;  %v501_v58 = vsub.f32 %v473_v47, %v496_v57 }
  0xef   : > { %v585_v61 = vrot.slane %v501_v58, 7  ;;  %v590_v3 = vrot.slane %v501_v58, 1 }
  0xf4   : > { %v498_v59 = vpop.f32.mrf.mxu0 }
  0xf5   : > { %v502_v60 = vsub.f32 %v474_v48, %v498_v59  ;;  %504 = vst.msk [vmem:[%s414_s28 + $0x8] sm:$0xff] %vm418_vm0, %v498_v59 }
  0xf7   : > { %v582_v62 = vrot.slane %v502_v60, 7  ;;  %v951_v63 = vpack.i.bf16 %v502_v60, %v501_v58  ;;  %v591_v0 = vrot.slane %v502_v60, 1 }
  0xf9   : > { %952 = vrot.lane.b32.xlu0 %v951_v63, %s1424_s20  ;;  %v586_v1 = vsel %vm511_vm7, %v585_v61, %v582_v62  ;;  %v589_v2 = vsel %vm511_vm7, %v582_v62, %v585_v61  ;;  %v592_v4 = vsel %vm517_vm6, %v590_v3, %v591_v0  ;;  %v595_v5 = vsel %vm517_vm6, %v591_v0, %v590_v3  ;;  %s1057_s20 = scalar_lea.hbm %s1422_s9, 32 }
  0xfa   : > { %v956_v6 = vpack.i.bf16 %v595_v5, %v592_v4  ;;  %p1059_p4 = scmp.lt.s32.totalorder %s1057_s20, %s1053_s0 }
  0xfc   : > { %p1060_p7 = por %p1059_p4, %p1058_p3 }
  0xfe   : > { %p1061_p8 = pnand %p1060_p7, %p1056_p2 }
 0x101   : > { %957 = vrot.lane.b32.xlu0 %v956_v6, %s1147_s21  ;;  %s654_s21 = scalar_lea.sflag [#allocation4], %s1334_s11 }
 0x169   : > { %v571_v44 = vpop.f32.mrf.mxu1 }
 0x16a   : > { %v572_v45 = vadd.f32 %v571_v44, %v505_v43 }
 0x16b   : > { %v953_v32 = vpop.permute.xlu0 %952 }
 0x16c   : > { %v955_v33 = vunpack.i.h.bf16 %v953_v32  ;;  %v954_v34 = vunpack.i.l.bf16 %v953_v32  ;;  %577 = vst.msk [vmem:[%s397_s27] sm:$0xff] %vm576_vm10, %v572_v45 }
 0x16e   : > { %v609_v38 = vsel %vm418_vm0, %v589_v2, %v954_v34  ;;  %v610_v39 = vsel %vm418_vm0, %v586_v1, %v955_v33 }
 0x171   : > { %v573_v47 = vpop.f32.mrf.mxu1 }
 0x172   : > { %v574_v48 = vadd.f32 %v573_v47, %v506_v46 }
 0x173   : > { %v958_v35 = vpop.permute.xlu0 %957 }
 0x174   : > { %v960_v36 = vunpack.i.h.bf16 %v958_v35  ;;  %v959_v37 = vunpack.i.l.bf16 %v958_v35  ;;  %578 = vst.msk [vmem:[%s397_s27 + $0x8] sm:$0xff] %vm576_vm10, %v574_v48 }
 0x176   : > { %v611_v40 = vsel %vm483_vm5, %v609_v38, %v959_v37  ;;  %v612_v41 = vsel %vm483_vm5, %v610_v39, %v960_v36 }
 0x177   : > { %v613_v42 = vpack.c.bf16 %v612_v41, %v611_v40 }
 0x179   : > { %864 = vmatmul.msk.bf16.vlgmr.msra.gmra.mxu2 %vm554_vm9, %v613_v42 }
 0x17a   : > { %1064 = shalt.err (!%p1061_p8)
}
 0x17b   : > { %s1148_s27 = smov 128   ;;  %s1442_s26 = smov 8   ;;  %v579_v49 = vld [vmem:[%s1420_s7] sm:$0xff]  ;;  %v580_v52 = vld [vmem:[%s1420_s7 + $0x8] sm:$0xff] }
 0x17c   : > { %888 = dma.vmem_to_hbm [thread:$0]  (%p1242_p5), %s675_s29, 256, %s677_s18, %s654_s21, %s1148_s27, %s1148_s27, %s1442_s26  }
 0x17d   : > { %s1443_s0 = sshll.u32 %s1334_s11, 4  ;;  %s1444_s20 = sshll.u32 %s1225_s17, 4 }
 0x17e   : > { %s404_s12 = scalar_lea.vmem [#allocation8], %s1443_s0  ;;  %s690_s1 = scalar_lea.hbm %s1423_s10, %s1444_s20 }
 0x17f   : > { %s691_s2 = sshll.u32 %s404_s12, 4  ;;  %s693_s29 = sshll.u32 %s690_s1, 4  ;;  %s692_s2 = int_to_ptr.vmem [resolvable:$true] %s691_s2  ;;  %s694_s29 = int_to_ptr.hbm [resolvable:$true] %s693_s29 }
 0x180   : > { %s659_s18 = scalar_lea.sflag [#allocation9], %s1334_s11  ;;  %s1079_s21 = sshra.s32 %s694_s29, 4  ;;  %s1080_s21 = int_to_ptr.hbm [resolvable:$true] %s1079_s21 }
 0x181   : > { %s1081_s17 = scalar_lea.hbm %s1080_s21, 16  ;;  %s1085_s3 = scalar_lea.hbm %s1423_s10, 32 }
 0x182   : > { %p1082_p9 = scmp.ne.s32.totalorder %s1080_s21, %s1081_s17  ;;  %p1086_p12 = scmp.lt.s32.totalorder %s1080_s21, %s1423_s10 }
 0x183   : > { %p1087_p13 = scmp.lt.s32.totalorder %s1085_s3, %s1081_s17 }
 0x184   : > { %p1083_p10 = pnand %p1082_p9, %p1242_p5 }
 0x185   : > { %p1088_p0 = por %p1087_p13, %p1086_p12 }
 0x186   : > { %p1084_p11 = pneg %p1083_p10 }
 0x188   : > { %p1089_p1 = pnand %p1088_p0, %p1084_p11 }
 0x1fc   : > { %v641_v50 = vpop.f32.mrf.mxu2 }
 0x1fd   : > { %v642_v51 = vadd.f32 %v641_v50, %v579_v49 }
 0x1ff   : > { %646 = vst.msk [vmem:[%s404_s12] sm:$0xff] %vm576_vm10, %v642_v51 }
 0x204   : > { %v643_v53 = vpop.f32.mrf.mxu2 }
 0x205   : > { %v644_v54 = vadd.f32 %v643_v53, %v580_v52 }
 0x207   : > { %647 = vst.msk [vmem:[%s404_s12 + $0x8] sm:$0xff] %vm576_vm10, %v644_v54 }
 0x208   : > { %1092 = shalt.err (!%p1089_p1)
}
 0x209   : > { %889 = dma.vmem_to_hbm [thread:$0]  (%p1242_p5), %s692_s2, 256, %s694_s29, %s659_s18, %s1148_s27, %s1148_s27, %s1442_s26  }
 0x20a PF: > { %p910_p2 = scmp.ge.s32.totalorder %s1139_s16, 2  ;;  %s716_s11 = sand.u32 1, %s1127_s13  }
 0x20b   : > { %s717_s0 = scalar_lea.sflag [#allocation4], %s716_s11 }
 0x20c   : > { %p900_p3 = pnand %p910_p2, %p1246_p6 }
 0x20e   : > { %p901_p4 = pneg %p900_p3 }
 0x210   : > { %1118 = dma.done.wait (%p901_p4), %s717_s0, 256  }
 0x211   : > { %1120 = vsyncadd (%p901_p4), %s717_s0, 4294967040  ;;  %s727_s12 = scalar_lea.sflag [#allocation9], %s716_s11 }
 0x212   : > { %1122 = dma.done.wait (%p901_p4), %s727_s12, 256  }
 0x213   : > { %1124 = vsyncadd (%p901_p4), %s727_s12, 4294967040  ;;  %s1445_s23 = sld [smem:[#allocation14_spill]]  ;;  %p26_p5 = scmp.ge.s32.totalorder %s1229_s19, 4  }
 0x214   : > { %s1446_s13 = smov %s1131_s14  ;;  %s1447_s14 = smov %s1135_s15 }
 0x215   : > { %s1449_s16 = smov %s1229_s19  ;;  %28 = sbr.rel (!%p26_p5) target bundleno = 13 (0xd), region = 125 }
 0x219   : > { %s1448_s15 = smov %s1445_s23 }
 0x21a   :  { %733 = vsyncpa [#allocation3], 1 }
 0x21b   :  { %735 = vsyncpa [#allocation3 + $0x1], 1 }
 0x21c   :  { %736 = vsyncpa [#allocation6], 1 }
 0x21d   :  { %737 = vsyncpa [#allocation4], 1 }
 0x21e   :  { %739 = vsyncpa [#allocation4 + $0x1], 1 }
 0x21f   :  { %740 = vsyncpa [#allocation9], 1 }
 0x220   :  { %742 = vsyncpa [#allocation9 + $0x1], 1 }

</bundles_post_ra>
